<compile_context>
chip_gen: v7x
topology: tpu7x:2x2x1
jax: 0.10.0
libtpu: 0.0.40
codegen_flags: <defaults>
</compile_context>

<pallas_src>
import jax
import jax.numpy as jnp
from jax.experimental import pallas as pl
from jax.experimental.pallas import tpu as pltpu


# ----------------------------- fused stem kernel --------------------------- #
def _fused_stem_kernel(ph_ref, w1_ref, b1_ref, w2_ref, b2_ref, o_ref, x1_scr):
    """Both conv3x3 + folded-BN + ReLU layers for ONE image, fully in VMEM.

    ph_ref : (4*(H1+1), W1+1, Cin) f32  stride-2 phases [ee, eo, oe, oo] of the
             pad-1 input, stacked phase-major along rows.
    w1_ref : (9, Cin, C1) f32  per-tap layer-1 weights (BN scale folded in).
    b1_ref : (1, C1)      f32  folded BN bias.
    w2_ref : (9, C1, C2)  f32  per-tap layer-2 weights (BN scale folded in).
    b2_ref : (1, C2)      f32
    o_ref  : (H1, W1, C2) f32  NHWC feature map for this image.
    x1_scr : (H1+2, W1+2, C1) f32 VMEM scratch (zero-padded layer-1 act).
    """
    H1, W1, C2 = o_ref.shape
    C1 = w1_ref.shape[-1]
    Hp, Wp = H1 + 1, W1 + 1
    M = H1 * W1

    # ---- layer 1: 3x3 / stride 2 / pad 1 (stride folded into the phases) ----
    # tap (di, dj) -> (phase, row offset, col offset); phases = [ee, eo, oe, oo]
    taps = ((0, 0, 0), (1, 0, 0), (0, 0, 1),   # di = 0
            (2, 0, 0), (3, 0, 0), (2, 0, 1),   # di = 1
            (0, 1, 0), (1, 1, 0), (0, 1, 1))   # di = 2
    acc1 = jnp.zeros((M, C1), jnp.float32)
    for t, (p, io, jo) in enumerate(taps):
        r0 = p * Hp + io
        slab = ph_ref[r0:r0 + H1, jo:jo + W1, :].reshape(M, -1)   # (M, Cin)
        acc1 = acc1 + jnp.dot(slab, w1_ref[t],
                              preferred_element_type=jnp.float32)
    x1 = jnp.maximum(acc1 + b1_ref[...], 0.0)                     # (M, C1)

    # Layer-1 activation never leaves VMEM: stash it zero-padded (pad=1).
    x1_scr[...] = jnp.zeros_like(x1_scr)
    x1_scr[1:H1 + 1, 1:W1 + 1, :] = x1.reshape(H1, W1, C1)

    # ---- layer 2: 3x3 / stride 1 / pad 1 ----
    acc2 = jnp.zeros((M, C2), jnp.float32)
    t = 0
    for di in range(3):
        for dj in range(3):
            slab = x1_scr[di:di + H1, dj:dj + W1, :].reshape(M, -1)  # (M, C1)
            acc2 = acc2 + jnp.dot(slab, w2_ref[t],
                                  preferred_element_type=jnp.float32)
            t += 1
    x2 = jnp.maximum(acc2 + b2_ref[...], 0.0)                     # (M, C2)
    o_ref[...] = x2.reshape(H1, W1, C2).astype(o_ref.dtype)


# --------------------------------- forward ---------------------------------- #
@jax.jit
def _forward_features(params, x_nchw):
    """NCHW in -> NCHW feature map out (== backbone.forward_features)."""
    x = jnp.transpose(x_nchw, (0, 2, 3, 1)).astype(jnp.float32)   # NHWC
    B, H, W, Cin = x.shape
    H1, W1 = H // 2, W // 2
    Hp, Wp = H1 + 1, W1 + 1
    C1 = params["w1"].shape[-1]
    C2 = params["w2"].shape[-1]

    # pad=1 then split into the four stride-2 phases (space-to-depth).  This is
    # the only HBM-side prep: ~1.3x the input bytes, vs ~9x for the previously
    # materialized im2col patch matrix.
    xp = jnp.pad(x, ((0, 0), (1, 1), (1, 1), (0, 0)))
    phases = jnp.stack(
        [xp[:, 0::2, 0::2, :], xp[:, 0::2, 1::2, :],
         xp[:, 1::2, 0::2, :], xp[:, 1::2, 1::2, :]], axis=1,
    ).reshape(B, 4 * Hp, Wp, Cin)

    out = pl.pallas_call(
        _fused_stem_kernel,
        out_shape=jax.ShapeDtypeStruct((B, H1, W1, C2), jnp.float32),
        grid_spec=pltpu.PrefetchScalarGridSpec(
            num_scalar_prefetch=0,
            grid=(B,),                               # >= 2 steps for megacore
            in_specs=[
                pl.BlockSpec((None, 4 * Hp, Wp, Cin), lambda b: (b, 0, 0, 0)),
                pl.BlockSpec((9, Cin, C1), lambda b: (0, 0, 0)),  # resident
                pl.BlockSpec((1, C1), lambda b: (0, 0)),          # resident
                pl.BlockSpec((9, C1, C2), lambda b: (0, 0, 0)),   # resident
                pl.BlockSpec((1, C2), lambda b: (0, 0)),          # resident
            ],
            out_specs=pl.BlockSpec((None, H1, W1, C2), lambda b: (b, 0, 0, 0)),
            scratch_shapes=[pltpu.VMEM((H1 + 2, W1 + 2, C1), jnp.float32)],
        ),
        compiler_params=pltpu.CompilerParams(
            dimension_semantics=("parallel",),
            # vmem_limit_bytes intentionally omitted: footprint is tens of KiB.
        ),
    )(phases, params["w1"], params["b1"], params["w2"], params["b2"])
    return jnp.transpose(out, (0, 3, 1, 2))          # NHWC -> NCHW at exit


# --------------------------- parameter preparation -------------------------- #
def _fold_conv_bn(w_oihw, gamma, beta, mean, var, eps=1e-5):
    """Fold eval-mode BatchNorm into a conv; returns per-tap weights + bias.

    w_oihw: PyTorch (Cout, Cin, kh, kw) ->  ((kh*kw, Cin, Cout), (1, Cout)),
    tap order (kh, kw) row-major, matching the kernel's tap loop.
    """
    scale = gamma / jnp.sqrt(var + eps)
    bias = beta - mean * scale
    cout, cin, kh, kw = w_oihw.shape
    wk = jnp.transpose(w_oihw, (2, 3, 1, 0)).reshape(kh * kw, cin, cout)
    return ((wk * scale[None, None, :]).astype(jnp.float32),
            bias.reshape(1, cout).astype(jnp.float32))


class TimmClassifierPallas:
    """features_only=True: forward(x) == backbone.forward_features(x)."""

    def __init__(self, key, in_chans=4, stem_ch=16, feat_ch=32,
                 features_only=True, eps=1e-5):
        self.features_only = features_only
        self.eps = eps
        k1, k2 = jax.random.split(key)
        # Raw PyTorch-layout parameters (conv OIHW + BatchNorm eval stats).
        self.raw_params = {
            "w1": 0.1 * jax.random.normal(k1, (stem_ch, in_chans, 3, 3),
                                          jnp.float32),
            "g1": jnp.ones((stem_ch,), jnp.float32),
            "b1": jnp.zeros((stem_ch,), jnp.float32),
            "m1": jnp.zeros((stem_ch,), jnp.float32),
            "v1": jnp.ones((stem_ch,), jnp.float32),
            "w2": 0.1 * jax.random.normal(k2, (feat_ch, stem_ch, 3, 3),
                                          jnp.float32),
            "g2": jnp.ones((feat_ch,), jnp.float32),
            "b2": jnp.zeros((feat_ch,), jnp.float32),
            "m2": jnp.zeros((feat_ch,), jnp.float32),
            "v2": jnp.ones((feat_ch,), jnp.float32),
        }
        # BN folded + reshaped ONCE at init (not per forward call).
        w1, b1 = _fold_conv_bn(self.raw_params["w1"], self.raw_params["g1"],
                               self.raw_params["b1"], self.raw_params["m1"],
                               self.raw_params["v1"], eps)
        w2, b2 = _fold_conv_bn(self.raw_params["w2"], self.raw_params["g2"],
                               self.raw_params["b2"], self.raw_params["m2"],
                               self.raw_params["v2"], eps)
        self.params = {"w1": w1, "b1": b1, "w2": w2, "b2": b2}
        self._num_features = feat_ch

    def forward_features(self, x):
        return _forward_features(self.params, x)

    def __call__(self, x):
        if self.features_only:
            return self.forward_features(x)
        # TODO(synk): non-features_only path would need global pool + head.
        return self.forward_features(x)

    @property
    def num_features(self):
        return self._num_features


# ------------------------------ pure-XLA reference -------------------------- #
def _reference_forward(raw, x_nchw, eps=1e-5):
    def conv_bn_relu(x, w, g, b, m, v, stride):
        y = jax.lax.conv_general_dilated(
            x, w, window_strides=(stride, stride), padding=((1, 1), (1, 1)),
            dimension_numbers=("NCHW", "OIHW", "NCHW"),
            precision=jax.lax.Precision.HIGHEST)
        scale = g / jnp.sqrt(v + eps)
        shift = b - m * scale
        return jnp.maximum(y * scale[None, :, None, None]
                           + shift[None, :, None, None], 0.0)

    x = conv_bn_relu(x_nchw, raw["w1"], raw["g1"], raw["b1"],
                     raw["m1"], raw["v1"], 2)
    x = conv_bn_relu(x, raw["w2"], raw["g2"], raw["b2"],
                     raw["m2"], raw["v2"], 1)
    return x


if __name__ == "__main__":
    key = jax.random.PRNGKey(0)
    k_params, k_x = jax.random.split(key)
    model = TimmClassifierPallas(k_params, in_chans=4, stem_ch=16, feat_ch=32)

    # PyTorch-style NCHW input: (batch=2, channels=4, 16, 16)
    x = jax.random.normal(k_x, (2, 4, 16, 16), jnp.float32)

    out = jax.block_until_ready(model(x))
    assert out.shape == (2, model.num_features, 8, 8), out.shape
    assert out.dtype == jnp.float32

    ref = jax.block_until_ready(_reference_forward(model.raw_params, x))
    max_err = float(jnp.max(jnp.abs(out - ref)))
    assert max_err < 5e-2, f"max abs err vs XLA conv reference: {max_err}"

    print("KERNEL_OK")
</pallas_src>

<mosaic_0001>
module attributes {stable_mosaic.version = 11 : i64} {
  func.func @_fused_stem_kernel(%arg0: i32, %arg1: memref<1x36x9x4xf32, #tpu.memory_space<vmem>>, %arg2: memref<9x4x16xf32, #tpu.memory_space<vmem>>, %arg3: memref<1x16xf32, #tpu.memory_space<vmem>>, %arg4: memref<9x16x32xf32, #tpu.memory_space<vmem>>, %arg5: memref<1x32xf32, #tpu.memory_space<vmem>>, %arg6: memref<1x8x8x32xf32, #tpu.memory_space<vmem>>, %arg7: memref<10x10x16xf32, #tpu.memory_space<vmem>>) attributes {dimension_semantics = [#tpu.dimension_semantics<parallel>], iteration_bounds = array<i64: 2>, scalar_prefetch = 0 : i64, scratch_operands = 1 : i64, tpu.core_type = #tpu.core_type<tc>, window_params = [{transform_indices = @transform_0, window_bounds = array<i64: 1, 36, 9, 4>}, {pipeline_mode = #tpu.pipeline_mode<synchronous>, transform_indices = @transform_1, window_bounds = array<i64: 9, 4, 16>}, {pipeline_mode = #tpu.pipeline_mode<synchronous>, transform_indices = @transform_2, window_bounds = array<i64: 1, 16>}, {pipeline_mode = #tpu.pipeline_mode<synchronous>, transform_indices = @transform_3, window_bounds = array<i64: 9, 16, 32>}, {pipeline_mode = #tpu.pipeline_mode<synchronous>, transform_indices = @transform_4, window_bounds = array<i64: 1, 32>}, {transform_indices = @transform_5, window_bounds = array<i64: 1, 8, 8, 32>}]} {
    %cst = arith.constant 0.000000e+00 : f32
    %0 = vector.broadcast %cst : f32 to vector<64x16xf32>
    %c0 = arith.constant 0 : index
    %c0_0 = arith.constant 0 : index
    %c0_1 = arith.constant 0 : index
    %c0_2 = arith.constant 0 : index
    %1 = vector.load %arg1[%c0, %c0_0, %c0_1, %c0_2] : memref<1x36x9x4xf32, #tpu.memory_space<vmem>>, vector<1x8x8x4xf32>
    %2 = vector.shape_cast %1 : vector<1x8x8x4xf32> to vector<8x8x4xf32>
    %3 = vector.shape_cast %2 : vector<8x8x4xf32> to vector<64x4xf32>
    %c0_3 = arith.constant 0 : index
    %c0_4 = arith.constant 0 : index
    %c0_5 = arith.constant 0 : index
    %4 = vector.load %arg2[%c0_3, %c0_4, %c0_5] : memref<9x4x16xf32, #tpu.memory_space<vmem>>, vector<1x4x16xf32>
    %5 = vector.shape_cast %4 : vector<1x4x16xf32> to vector<4x16xf32>
    %cst_6 = arith.constant dense<0.000000e+00> : vector<64x16xf32>
    %6 = tpu.matmul %3, %5, %cst_6 {dimension_numbers = #tpu.dot_dimension_numbers<[1], [0], [0], [1], [0, 0, 1, 1], [], []>} : vector<64x4xf32>, vector<4x16xf32>, vector<64x16xf32> -> vector<64x16xf32>
    %7 = arith.addf %0, %6 : vector<64x16xf32>
    %c0_7 = arith.constant 0 : index
    %c9 = arith.constant 9 : index
    %c0_8 = arith.constant 0 : index
    %c0_9 = arith.constant 0 : index
    %8 = vector.load %arg1[%c0_7, %c9, %c0_8, %c0_9] : memref<1x36x9x4xf32, #tpu.memory_space<vmem>>, vector<1x8x8x4xf32>
    %9 = vector.shape_cast %8 : vector<1x8x8x4xf32> to vector<8x8x4xf32>
    %10 = vector.shape_cast %9 : vector<8x8x4xf32> to vector<64x4xf32>
    %c1 = arith.constant 1 : index
    %c0_10 = arith.constant 0 : index
    %c0_11 = arith.constant 0 : index
    %11 = vector.load %arg2[%c1, %c0_10, %c0_11] : memref<9x4x16xf32, #tpu.memory_space<vmem>>, vector<1x4x16xf32>
    %12 = vector.shape_cast %11 : vector<1x4x16xf32> to vector<4x16xf32>
    %cst_12 = arith.constant dense<0.000000e+00> : vector<64x16xf32>
    %13 = tpu.matmul %10, %12, %cst_12 {dimension_numbers = #tpu.dot_dimension_numbers<[1], [0], [0], [1], [0, 0, 1, 1], [], []>} : vector<64x4xf32>, vector<4x16xf32>, vector<64x16xf32> -> vector<64x16xf32>
    %14 = arith.addf %7, %13 : vector<64x16xf32>
    %c0_13 = arith.constant 0 : index
    %c0_14 = arith.constant 0 : index
    %c1_15 = arith.constant 1 : index
    %c0_16 = arith.constant 0 : index
    %15 = vector.load %arg1[%c0_13, %c0_14, %c1_15, %c0_16] : memref<1x36x9x4xf32, #tpu.memory_space<vmem>>, vector<1x8x8x4xf32>
    %16 = vector.shape_cast %15 : vector<1x8x8x4xf32> to vector<8x8x4xf32>
    %17 = vector.shape_cast %16 : vector<8x8x4xf32> to vector<64x4xf32>
    %c2 = arith.constant 2 : index
    %c0_17 = arith.constant 0 : index
    %c0_18 = arith.constant 0 : index
    %18 = vector.load %arg2[%c2, %c0_17, %c0_18] : memref<9x4x16xf32, #tpu.memory_space<vmem>>, vector<1x4x16xf32>
    %19 = vector.shape_cast %18 : vector<1x4x16xf32> to vector<4x16xf32>
    %cst_19 = arith.constant dense<0.000000e+00> : vector<64x16xf32>
    %20 = tpu.matmul %17, %19, %cst_19 {dimension_numbers = #tpu.dot_dimension_numbers<[1], [0], [0], [1], [0, 0, 1, 1], [], []>} : vector<64x4xf32>, vector<4x16xf32>, vector<64x16xf32> -> vector<64x16xf32>
    %21 = arith.addf %14, %20 : vector<64x16xf32>
    %c0_20 = arith.constant 0 : index
    %c18 = arith.constant 18 : index
    %c0_21 = arith.constant 0 : index
    %c0_22 = arith.constant 0 : index
    %22 = vector.load %arg1[%c0_20, %c18, %c0_21, %c0_22] : memref<1x36x9x4xf32, #tpu.memory_space<vmem>>, vector<1x8x8x4xf32>
    %23 = vector.shape_cast %22 : vector<1x8x8x4xf32> to vector<8x8x4xf32>
    %24 = vector.shape_cast %23 : vector<8x8x4xf32> to vector<64x4xf32>
    %c3 = arith.constant 3 : index
    %c0_23 = arith.constant 0 : index
    %c0_24 = arith.constant 0 : index
    %25 = vector.load %arg2[%c3, %c0_23, %c0_24] : memref<9x4x16xf32, #tpu.memory_space<vmem>>, vector<1x4x16xf32>
    %26 = vector.shape_cast %25 : vector<1x4x16xf32> to vector<4x16xf32>
    %cst_25 = arith.constant dense<0.000000e+00> : vector<64x16xf32>
    %27 = tpu.matmul %24, %26, %cst_25 {dimension_numbers = #tpu.dot_dimension_numbers<[1], [0], [0], [1], [0, 0, 1, 1], [], []>} : vector<64x4xf32>, vector<4x16xf32>, vector<64x16xf32> -> vector<64x16xf32>
    %28 = arith.addf %21, %27 : vector<64x16xf32>
    %c0_26 = arith.constant 0 : index
    %c27 = arith.constant 27 : index
    %c0_27 = arith.constant 0 : index
    %c0_28 = arith.constant 0 : index
    %29 = vector.load %arg1[%c0_26, %c27, %c0_27, %c0_28] : memref<1x36x9x4xf32, #tpu.memory_space<vmem>>, vector<1x8x8x4xf32>
    %30 = vector.shape_cast %29 : vector<1x8x8x4xf32> to vector<8x8x4xf32>
    %31 = vector.shape_cast %30 : vector<8x8x4xf32> to vector<64x4xf32>
    %c4 = arith.constant 4 : index
    %c0_29 = arith.constant 0 : index
    %c0_30 = arith.constant 0 : index
    %32 = vector.load %arg2[%c4, %c0_29, %c0_30] : memref<9x4x16xf32, #tpu.memory_space<vmem>>, vector<1x4x16xf32>
    %33 = vector.shape_cast %32 : vector<1x4x16xf32> to vector<4x16xf32>
    %cst_31 = arith.constant dense<0.000000e+00> : vector<64x16xf32>
    %34 = tpu.matmul %31, %33, %cst_31 {dimension_numbers = #tpu.dot_dimension_numbers<[1], [0], [0], [1], [0, 0, 1, 1], [], []>} : vector<64x4xf32>, vector<4x16xf32>, vector<64x16xf32> -> vector<64x16xf32>
    %35 = arith.addf %28, %34 : vector<64x16xf32>
    %c0_32 = arith.constant 0 : index
    %c18_33 = arith.constant 18 : index
    %c1_34 = arith.constant 1 : index
    %c0_35 = arith.constant 0 : index
    %36 = vector.load %arg1[%c0_32, %c18_33, %c1_34, %c0_35] : memref<1x36x9x4xf32, #tpu.memory_space<vmem>>, vector<1x8x8x4xf32>
    %37 = vector.shape_cast %36 : vector<1x8x8x4xf32> to vector<8x8x4xf32>
    %38 = vector.shape_cast %37 : vector<8x8x4xf32> to vector<64x4xf32>
    %c5 = arith.constant 5 : index
    %c0_36 = arith.constant 0 : index
    %c0_37 = arith.constant 0 : index
    %39 = vector.load %arg2[%c5, %c0_36, %c0_37] : memref<9x4x16xf32, #tpu.memory_space<vmem>>, vector<1x4x16xf32>
    %40 = vector.shape_cast %39 : vector<1x4x16xf32> to vector<4x16xf32>
    %cst_38 = arith.constant dense<0.000000e+00> : vector<64x16xf32>
    %41 = tpu.matmul %38, %40, %cst_38 {dimension_numbers = #tpu.dot_dimension_numbers<[1], [0], [0], [1], [0, 0, 1, 1], [], []>} : vector<64x4xf32>, vector<4x16xf32>, vector<64x16xf32> -> vector<64x16xf32>
    %42 = arith.addf %35, %41 : vector<64x16xf32>
    %c0_39 = arith.constant 0 : index
    %c1_40 = arith.constant 1 : index
    %c0_41 = arith.constant 0 : index
    %c0_42 = arith.constant 0 : index
    %43 = vector.load %arg1[%c0_39, %c1_40, %c0_41, %c0_42] : memref<1x36x9x4xf32, #tpu.memory_space<vmem>>, vector<1x8x8x4xf32>
    %44 = vector.shape_cast %43 : vector<1x8x8x4xf32> to vector<8x8x4xf32>
    %45 = vector.shape_cast %44 : vector<8x8x4xf32> to vector<64x4xf32>
    %c6 = arith.constant 6 : index
    %c0_43 = arith.constant 0 : index
    %c0_44 = arith.constant 0 : index
    %46 = vector.load %arg2[%c6, %c0_43, %c0_44] : memref<9x4x16xf32, #tpu.memory_space<vmem>>, vector<1x4x16xf32>
    %47 = vector.shape_cast %46 : vector<1x4x16xf32> to vector<4x16xf32>
    %cst_45 = arith.constant dense<0.000000e+00> : vector<64x16xf32>
    %48 = tpu.matmul %45, %47, %cst_45 {dimension_numbers = #tpu.dot_dimension_numbers<[1], [0], [0], [1], [0, 0, 1, 1], [], []>} : vector<64x4xf32>, vector<4x16xf32>, vector<64x16xf32> -> vector<64x16xf32>
    %49 = arith.addf %42, %48 : vector<64x16xf32>
    %c0_46 = arith.constant 0 : index
    %c10 = arith.constant 10 : index
    %c0_47 = arith.constant 0 : index
    %c0_48 = arith.constant 0 : index
    %50 = vector.load %arg1[%c0_46, %c10, %c0_47, %c0_48] : memref<1x36x9x4xf32, #tpu.memory_space<vmem>>, vector<1x8x8x4xf32>
    %51 = vector.shape_cast %50 : vector<1x8x8x4xf32> to vector<8x8x4xf32>
    %52 = vector.shape_cast %51 : vector<8x8x4xf32> to vector<64x4xf32>
    %c7 = arith.constant 7 : index
    %c0_49 = arith.constant 0 : index
    %c0_50 = arith.constant 0 : index
    %53 = vector.load %arg2[%c7, %c0_49, %c0_50] : memref<9x4x16xf32, #tpu.memory_space<vmem>>, vector<1x4x16xf32>
    %54 = vector.shape_cast %53 : vector<1x4x16xf32> to vector<4x16xf32>
    %cst_51 = arith.constant dense<0.000000e+00> : vector<64x16xf32>
    %55 = tpu.matmul %52, %54, %cst_51 {dimension_numbers = #tpu.dot_dimension_numbers<[1], [0], [0], [1], [0, 0, 1, 1], [], []>} : vector<64x4xf32>, vector<4x16xf32>, vector<64x16xf32> -> vector<64x16xf32>
    %56 = arith.addf %49, %55 : vector<64x16xf32>
    %c0_52 = arith.constant 0 : index
    %c1_53 = arith.constant 1 : index
    %c1_54 = arith.constant 1 : index
    %c0_55 = arith.constant 0 : index
    %57 = vector.load %arg1[%c0_52, %c1_53, %c1_54, %c0_55] : memref<1x36x9x4xf32, #tpu.memory_space<vmem>>, vector<1x8x8x4xf32>
    %58 = vector.shape_cast %57 : vector<1x8x8x4xf32> to vector<8x8x4xf32>
    %59 = vector.shape_cast %58 : vector<8x8x4xf32> to vector<64x4xf32>
    %c8 = arith.constant 8 : index
    %c0_56 = arith.constant 0 : index
    %c0_57 = arith.constant 0 : index
    %60 = vector.load %arg2[%c8, %c0_56, %c0_57] : memref<9x4x16xf32, #tpu.memory_space<vmem>>, vector<1x4x16xf32>
    %61 = vector.shape_cast %60 : vector<1x4x16xf32> to vector<4x16xf32>
    %cst_58 = arith.constant dense<0.000000e+00> : vector<64x16xf32>
    %62 = tpu.matmul %59, %61, %cst_58 {dimension_numbers = #tpu.dot_dimension_numbers<[1], [0], [0], [1], [0, 0, 1, 1], [], []>} : vector<64x4xf32>, vector<4x16xf32>, vector<64x16xf32> -> vector<64x16xf32>
    %63 = arith.addf %56, %62 : vector<64x16xf32>
    %c0_59 = arith.constant 0 : index
    %c0_60 = arith.constant 0 : index
    %64 = vector.load %arg3[%c0_59, %c0_60] : memref<1x16xf32, #tpu.memory_space<vmem>>, vector<1x16xf32>
    %65 = vector.broadcast %64 : vector<1x16xf32> to vector<64x16xf32>
    %66 = arith.addf %63, %65 : vector<64x16xf32>
    %cst_61 = arith.constant 0.000000e+00 : f32
    %67 = vector.broadcast %cst_61 : f32 to vector<64x16xf32>
    %68 = arith.maximumf %66, %67 : vector<64x16xf32>
    %cst_62 = arith.constant 0.000000e+00 : f32
    %69 = vector.broadcast %cst_62 : f32 to vector<10x10x16xf32>
    %c0_63 = arith.constant 0 : index
    %c0_64 = arith.constant 0 : index
    %c0_65 = arith.constant 0 : index
    %70 = vector.load %arg7[%c0_63, %c0_64, %c0_65] : memref<10x10x16xf32, #tpu.memory_space<vmem>>, vector<10x10x16xf32>
    tpu.vector_store %arg7[%c0_63, %c0_64, %c0_65], %69 {strides = array<i32>} : memref<10x10x16xf32, #tpu.memory_space<vmem>>, vector<10x10x16xf32>,
    %71 = vector.shape_cast %68 : vector<64x16xf32> to vector<8x8x16xf32>
    %c1_66 = arith.constant 1 : index
    %c1_67 = arith.constant 1 : index
    %c0_68 = arith.constant 0 : index
    %72 = vector.load %arg7[%c1_66, %c1_67, %c0_68] : memref<10x10x16xf32, #tpu.memory_space<vmem>>, vector<8x8x16xf32>
    tpu.vector_store %arg7[%c1_66, %c1_67, %c0_68], %71 {strides = array<i32>} : memref<10x10x16xf32, #tpu.memory_space<vmem>>, vector<8x8x16xf32>,
    %cst_69 = arith.constant 0.000000e+00 : f32
    %73 = vector.broadcast %cst_69 : f32 to vector<64x32xf32>
    %c0_70 = arith.constant 0 : index
    %c0_71 = arith.constant 0 : index
    %c0_72 = arith.constant 0 : index
    %74 = vector.load %arg7[%c0_70, %c0_71, %c0_72] : memref<10x10x16xf32, #tpu.memory_space<vmem>>, vector<8x8x16xf32>
    %75 = vector.shape_cast %74 : vector<8x8x16xf32> to vector<64x16xf32>
    %c0_73 = arith.constant 0 : index
    %c0_74 = arith.constant 0 : index
    %c0_75 = arith.constant 0 : index
    %76 = vector.load %arg4[%c0_73, %c0_74, %c0_75] : memref<9x16x32xf32, #tpu.memory_space<vmem>>, vector<1x16x32xf32>
    %77 = vector.shape_cast %76 : vector<1x16x32xf32> to vector<16x32xf32>
    %cst_76 = arith.constant dense<0.000000e+00> : vector<64x32xf32>
    %78 = tpu.matmul %75, %77, %cst_76 {dimension_numbers = #tpu.dot_dimension_numbers<[1], [0], [0], [1], [0, 0, 1, 1], [], []>} : vector<64x16xf32>, vector<16x32xf32>, vector<64x32xf32> -> vector<64x32xf32>
    %79 = arith.addf %73, %78 : vector<64x32xf32>
    %c0_77 = arith.constant 0 : index
    %c1_78 = arith.constant 1 : index
    %c0_79 = arith.constant 0 : index
    %80 = vector.load %arg7[%c0_77, %c1_78, %c0_79] : memref<10x10x16xf32, #tpu.memory_space<vmem>>, vector<8x8x16xf32>
    %81 = vector.shape_cast %80 : vector<8x8x16xf32> to vector<64x16xf32>
    %c1_80 = arith.constant 1 : index
    %c0_81 = arith.constant 0 : index
    %c0_82 = arith.constant 0 : index
    %82 = vector.load %arg4[%c1_80, %c0_81, %c0_82] : memref<9x16x32xf32, #tpu.memory_space<vmem>>, vector<1x16x32xf32>
    %83 = vector.shape_cast %82 : vector<1x16x32xf32> to vector<16x32xf32>
    %cst_83 = arith.constant dense<0.000000e+00> : vector<64x32xf32>
    %84 = tpu.matmul %81, %83, %cst_83 {dimension_numbers = #tpu.dot_dimension_numbers<[1], [0], [0], [1], [0, 0, 1, 1], [], []>} : vector<64x16xf32>, vector<16x32xf32>, vector<64x32xf32> -> vector<64x32xf32>
    %85 = arith.addf %79, %84 : vector<64x32xf32>
    %c0_84 = arith.constant 0 : index
    %c2_85 = arith.constant 2 : index
    %c0_86 = arith.constant 0 : index
    %86 = vector.load %arg7[%c0_84, %c2_85, %c0_86] : memref<10x10x16xf32, #tpu.memory_space<vmem>>, vector<8x8x16xf32>
    %87 = vector.shape_cast %86 : vector<8x8x16xf32> to vector<64x16xf32>
    %c2_87 = arith.constant 2 : index
    %c0_88 = arith.constant 0 : index
    %c0_89 = arith.constant 0 : index
    %88 = vector.load %arg4[%c2_87, %c0_88, %c0_89] : memref<9x16x32xf32, #tpu.memory_space<vmem>>, vector<1x16x32xf32>
    %89 = vector.shape_cast %88 : vector<1x16x32xf32> to vector<16x32xf32>
    %cst_90 = arith.constant dense<0.000000e+00> : vector<64x32xf32>
    %90 = tpu.matmul %87, %89, %cst_90 {dimension_numbers = #tpu.dot_dimension_numbers<[1], [0], [0], [1], [0, 0, 1, 1], [], []>} : vector<64x16xf32>, vector<16x32xf32>, vector<64x32xf32> -> vector<64x32xf32>
    %91 = arith.addf %85, %90 : vector<64x32xf32>
    %c1_91 = arith.constant 1 : index
    %c0_92 = arith.constant 0 : index
    %c0_93 = arith.constant 0 : index
    %92 = vector.load %arg7[%c1_91, %c0_92, %c0_93] : memref<10x10x16xf32, #tpu.memory_space<vmem>>, vector<8x8x16xf32>
    %93 = vector.shape_cast %92 : vector<8x8x16xf32> to vector<64x16xf32>
    %c3_94 = arith.constant 3 : index
    %c0_95 = arith.constant 0 : index
    %c0_96 = arith.constant 0 : index
    %94 = vector.load %arg4[%c3_94, %c0_95, %c0_96] : memref<9x16x32xf32, #tpu.memory_space<vmem>>, vector<1x16x32xf32>
    %95 = vector.shape_cast %94 : vector<1x16x32xf32> to vector<16x32xf32>
    %cst_97 = arith.constant dense<0.000000e+00> : vector<64x32xf32>
    %96 = tpu.matmul %93, %95, %cst_97 {dimension_numbers = #tpu.dot_dimension_numbers<[1], [0], [0], [1], [0, 0, 1, 1], [], []>} : vector<64x16xf32>, vector<16x32xf32>, vector<64x32xf32> -> vector<64x32xf32>
    %97 = arith.addf %91, %96 : vector<64x32xf32>
    %c1_98 = arith.constant 1 : index
    %c1_99 = arith.constant 1 : index
    %c0_100 = arith.constant 0 : index
    %98 = vector.load %arg7[%c1_98, %c1_99, %c0_100] : memref<10x10x16xf32, #tpu.memory_space<vmem>>, vector<8x8x16xf32>
    %99 = vector.shape_cast %98 : vector<8x8x16xf32> to vector<64x16xf32>
    %c4_101 = arith.constant 4 : index
    %c0_102 = arith.constant 0 : index
    %c0_103 = arith.constant 0 : index
    %100 = vector.load %arg4[%c4_101, %c0_102, %c0_103] : memref<9x16x32xf32, #tpu.memory_space<vmem>>, vector<1x16x32xf32>
    %101 = vector.shape_cast %100 : vector<1x16x32xf32> to vector<16x32xf32>
    %cst_104 = arith.constant dense<0.000000e+00> : vector<64x32xf32>
    %102 = tpu.matmul %99, %101, %cst_104 {dimension_numbers = #tpu.dot_dimension_numbers<[1], [0], [0], [1], [0, 0, 1, 1], [], []>} : vector<64x16xf32>, vector<16x32xf32>, vector<64x32xf32> -> vector<64x32xf32>
    %103 = arith.addf %97, %102 : vector<64x32xf32>
    %c1_105 = arith.constant 1 : index
    %c2_106 = arith.constant 2 : index
    %c0_107 = arith.constant 0 : index
    %104 = vector.load %arg7[%c1_105, %c2_106, %c0_107] : memref<10x10x16xf32, #tpu.memory_space<vmem>>, vector<8x8x16xf32>
    %105 = vector.shape_cast %104 : vector<8x8x16xf32> to vector<64x16xf32>
    %c5_108 = arith.constant 5 : index
    %c0_109 = arith.constant 0 : index
    %c0_110 = arith.constant 0 : index
    %106 = vector.load %arg4[%c5_108, %c0_109, %c0_110] : memref<9x16x32xf32, #tpu.memory_space<vmem>>, vector<1x16x32xf32>
    %107 = vector.shape_cast %106 : vector<1x16x32xf32> to vector<16x32xf32>
    %cst_111 = arith.constant dense<0.000000e+00> : vector<64x32xf32>
    %108 = tpu.matmul %105, %107, %cst_111 {dimension_numbers = #tpu.dot_dimension_numbers<[1], [0], [0], [1], [0, 0, 1, 1], [], []>} : vector<64x16xf32>, vector<16x32xf32>, vector<64x32xf32> -> vector<64x32xf32>
    %109 = arith.addf %103, %108 : vector<64x32xf32>
    %c2_112 = arith.constant 2 : index
    %c0_113 = arith.constant 0 : index
    %c0_114 = arith.constant 0 : index
    %110 = vector.load %arg7[%c2_112, %c0_113, %c0_114] : memref<10x10x16xf32, #tpu.memory_space<vmem>>, vector<8x8x16xf32>
    %111 = vector.shape_cast %110 : vector<8x8x16xf32> to vector<64x16xf32>
    %c6_115 = arith.constant 6 : index
    %c0_116 = arith.constant 0 : index
    %c0_117 = arith.constant 0 : index
    %112 = vector.load %arg4[%c6_115, %c0_116, %c0_117] : memref<9x16x32xf32, #tpu.memory_space<vmem>>, vector<1x16x32xf32>
    %113 = vector.shape_cast %112 : vector<1x16x32xf32> to vector<16x32xf32>
    %cst_118 = arith.constant dense<0.000000e+00> : vector<64x32xf32>
    %114 = tpu.matmul %111, %113, %cst_118 {dimension_numbers = #tpu.dot_dimension_numbers<[1], [0], [0], [1], [0, 0, 1, 1], [], []>} : vector<64x16xf32>, vector<16x32xf32>, vector<64x32xf32> -> vector<64x32xf32>
    %115 = arith.addf %109, %114 : vector<64x32xf32>
    %c2_119 = arith.constant 2 : index
    %c1_120 = arith.constant 1 : index
    %c0_121 = arith.constant 0 : index
    %116 = vector.load %arg7[%c2_119, %c1_120, %c0_121] : memref<10x10x16xf32, #tpu.memory_space<vmem>>, vector<8x8x16xf32>
    %117 = vector.shape_cast %116 : vector<8x8x16xf32> to vector<64x16xf32>
    %c7_122 = arith.constant 7 : index
    %c0_123 = arith.constant 0 : index
    %c0_124 = arith.constant 0 : index
    %118 = vector.load %arg4[%c7_122, %c0_123, %c0_124] : memref<9x16x32xf32, #tpu.memory_space<vmem>>, vector<1x16x32xf32>
    %119 = vector.shape_cast %118 : vector<1x16x32xf32> to vector<16x32xf32>
    %cst_125 = arith.constant dense<0.000000e+00> : vector<64x32xf32>
    %120 = tpu.matmul %117, %119, %cst_125 {dimension_numbers = #tpu.dot_dimension_numbers<[1], [0], [0], [1], [0, 0, 1, 1], [], []>} : vector<64x16xf32>, vector<16x32xf32>, vector<64x32xf32> -> vector<64x32xf32>
    %121 = arith.addf %115, %120 : vector<64x32xf32>
    %c2_126 = arith.constant 2 : index
    %c2_127 = arith.constant 2 : index
    %c0_128 = arith.constant 0 : index
    %122 = vector.load %arg7[%c2_126, %c2_127, %c0_128] : memref<10x10x16xf32, #tpu.memory_space<vmem>>, vector<8x8x16xf32>
    %123 = vector.shape_cast %122 : vector<8x8x16xf32> to vector<64x16xf32>
    %c8_129 = arith.constant 8 : index
    %c0_130 = arith.constant 0 : index
    %c0_131 = arith.constant 0 : index
    %124 = vector.load %arg4[%c8_129, %c0_130, %c0_131] : memref<9x16x32xf32, #tpu.memory_space<vmem>>, vector<1x16x32xf32>
    %125 = vector.shape_cast %124 : vector<1x16x32xf32> to vector<16x32xf32>
    %cst_132 = arith.constant dense<0.000000e+00> : vector<64x32xf32>
    %126 = tpu.matmul %123, %125, %cst_132 {dimension_numbers = #tpu.dot_dimension_numbers<[1], [0], [0], [1], [0, 0, 1, 1], [], []>} : vector<64x16xf32>, vector<16x32xf32>, vector<64x32xf32> -> vector<64x32xf32>
    %127 = arith.addf %121, %126 : vector<64x32xf32>
    %c0_133 = arith.constant 0 : index
    %c0_134 = arith.constant 0 : index
    %128 = vector.load %arg5[%c0_133, %c0_134] : memref<1x32xf32, #tpu.memory_space<vmem>>, vector<1x32xf32>
    %129 = vector.broadcast %128 : vector<1x32xf32> to vector<64x32xf32>
    %130 = arith.addf %127, %129 : vector<64x32xf32>
    %cst_135 = arith.constant 0.000000e+00 : f32
    %131 = vector.broadcast %cst_135 : f32 to vector<64x32xf32>
    %132 = arith.maximumf %130, %131 : vector<64x32xf32>
    %133 = vector.shape_cast %132 : vector<64x32xf32> to vector<8x8x32xf32>
    %c0_136 = arith.constant 0 : index
    %c0_137 = arith.constant 0 : index
    %c0_138 = arith.constant 0 : index
    %c0_139 = arith.constant 0 : index
    %134 = vector.load %arg6[%c0_136, %c0_137, %c0_138, %c0_139] : memref<1x8x8x32xf32, #tpu.memory_space<vmem>>, vector<1x8x8x32xf32>
    %135 = vector.shape_cast %134 : vector<1x8x8x32xf32> to vector<8x8x32xf32>
    %136 = vector.shape_cast %133 : vector<8x8x32xf32> to vector<1x8x8x32xf32>
    tpu.vector_store %arg6[%c0_136, %c0_137, %c0_138, %c0_139], %136 {strides = array<i32>} : memref<1x8x8x32xf32, #tpu.memory_space<vmem>>, vector<1x8x8x32xf32>,
    return
  }
  func.func @transform_0(%arg0: i32) -> (i32, i32, i32, i32) {
    %c0_i32 = arith.constant 0 : i32
    %c0_i32_0 = arith.constant 0 : i32
    %c0_i32_1 = arith.constant 0 : i32
    %c0_i32_2 = arith.constant 0 : i32
    return %arg0, %c0_i32, %c0_i32_0, %c0_i32_1 : i32, i32, i32, i32
  }
  func.func @transform_1(%arg0: i32) -> (i32, i32, i32) {
    %c0_i32 = arith.constant 0 : i32
    %c0_i32_0 = arith.constant 0 : i32
    %c0_i32_1 = arith.constant 0 : i32
    %c0_i32_2 = arith.constant 0 : i32
    return %c0_i32, %c0_i32_0, %c0_i32_1 : i32, i32, i32
  }
  func.func @transform_2(%arg0: i32) -> (i32, i32) {
    %c0_i32 = arith.constant 0 : i32
    %c0_i32_0 = arith.constant 0 : i32
    %c0_i32_1 = arith.constant 0 : i32
    return %c0_i32, %c0_i32_0 : i32, i32
  }
  func.func @transform_3(%arg0: i32) -> (i32, i32, i32) {
    %c0_i32 = arith.constant 0 : i32
    %c0_i32_0 = arith.constant 0 : i32
    %c0_i32_1 = arith.constant 0 : i32
    %c0_i32_2 = arith.constant 0 : i32
    return %c0_i32, %c0_i32_0, %c0_i32_1 : i32, i32, i32
  }
  func.func @transform_4(%arg0: i32) -> (i32, i32) {
    %c0_i32 = arith.constant 0 : i32
    %c0_i32_0 = arith.constant 0 : i32
    %c0_i32_1 = arith.constant 0 : i32
    return %c0_i32, %c0_i32_0 : i32, i32
  }
  func.func @transform_5(%arg0: i32) -> (i32, i32, i32, i32) {
    %c0_i32 = arith.constant 0 : i32
    %c0_i32_0 = arith.constant 0 : i32
    %c0_i32_1 = arith.constant 0 : i32
    %c0_i32_2 = arith.constant 0 : i32
    return %arg0, %c0_i32, %c0_i32_0, %c0_i32_1 : i32, i32, i32, i32
  }
}

</mosaic_0001>

<bundles_post_ra>
// kernel: _forward_features.1
= control target key start
LH: loop header
LB: loop body
LE: loop exit
PB: predicated region body
PF: predicated region fallthrough
CT: control target
= control target key end

     0   :  { %10 = vsyncpa [#allocation4], 0  ;;  %s4657_s0 = inlined_call_operand.vmem [shape: f32[2,36,9,4], index: 0, kind: input, shape index: {}]   ;;  %s4658_s1 = inlined_call_operand.vmem [shape: f32[9,4,16], index: 1, kind: input, shape index: {}]   ;;  %s4659_s2 = inlined_call_operand.vmem [shape: f32[1,16], index: 2, kind: input, shape index: {}]   ;;  %s4660_s3 = inlined_call_operand.vmem [shape: f32[9,16,32], index: 3, kind: input, shape index: {}]   ;;  %s4661_s4 = inlined_call_operand.vmem [shape: f32[1,32], index: 4, kind: input, shape index: {}]   ;;  %s4662_s5 = inlined_call_operand.hbm [shape: f32[2,8,8,32], index: 5, kind: output, shape index: {}]  }
   0x1   :  { %12 = vsyncpa [#allocation4 + $0x1], 0  ;;  %s4034_s18 = smov 0   ;;  %s4036_s19 = smov 0  }
   0x2   :  { %s4038_s20 = smov 0   ;;  %s4040_s21 = smov 0  }
   0x3 LB: > { %s4055_s22 = sadd.s32 4294967295, %s3998_s21   ;;  %s3041_s23 = sadd.s32 4294967294, %s3998_s21   ;;  %s3998_s21 = sphi %s4040_s21, %s4668_s21   ;;  %s3994_s20 = sphi %s4038_s20, %s4667_s20   ;;  %s3990_s19 = sphi %s4036_s19, %s4666_s19   ;;  %s3986_s18 = sphi %s4034_s18, %s4665_s18  }
   0x4   : > { %s4059_s24 = sadd.s32 1, %s3998_s21   ;;  %s135_s25 = sadd.s32 1, %s3994_s20 }
   0x5   : > { %s132_s26 = ssub.s32 %s3998_s21, %s4059_s24  ;;  %p145_p0 = scmp.ne.s32.totalorder %s3994_s20, %s3990_s19 }
   0x6   : > { %p133_p1 = scmp.eq.s32.totalorder %s132_s26, 0  ;;  %p146_p2 = scmp.eq.s32.totalorder %s4055_s22, 1 }
   0x7   : > { %p151_p3 = scmp.ne.s32.totalorder %s3990_s19, %s3986_s18  ;;  %p152_p4 = scmp.eq.s32.totalorder %s3041_s23, 1 }
   0x8   : > { %s4070_s27 = scalar_select %p133_p1, %s3994_s20, %s135_s25  }
   0x9   : > { %p4072_p5 = por %p146_p2, %p145_p0  ;;  %p4076_p6 = por %p152_p4, %p151_p3 }
   0xa   : > { %p3044_p7 = scmp.ge.s32.totalorder %s3998_s21, 1  ;;  %p190_p8 = scmp.lt.s32.totalorder %s3998_s21, 3 }
   0xc   : > { %p191_p9 = pnand %p3044_p7, %p190_p8 }
   0xd   : > { %v3055_v0 = vld [vmem:[%s4658_s1 + $0x4] sm:$0xf] (!%p191_p9)  ;;  %vm268_vm0 = vcmask (!%p191_p9), 1043456   ;;  %p218_p10 = scmp.lt.s32.totalorder (!%p191_p9), %s4055_s22, 1  ;;  %v231_v1 = vld [vmem:[%s4658_s1] sm:$0xf] (!%p191_p9) }
   0xe   : > { %194 = sbr.rel (%p191_p9) target bundleno = 753 (0x2f1), region = 40  ;;  %3459 = vmatprep.subr.msk.mxu0 (!%p191_p9), %vm268_vm0, %v3055_v0  ;;  %vm243_vm1 = vcmask (!%p191_p9), 31744   ;;  %v3074_v5 = vld [vmem:[%s4658_s1 + $0x8] sm:$0xf] (!%p191_p9)  ;;  %v3092_v14 = vld [vmem:[%s4658_s1 + $0xc] sm:$0xf] (!%p191_p9) }
   0xf   : > { %3460 = vmatpush3.msk.msra.mxu0 (!%p191_p9), %vm268_vm0, %v3055_v0  ;;  %v3110_v23 = vld [vmem:[%s4658_s1 + $0x10] sm:$0xf] (!%p191_p9)  ;;  %v3128_v32 = vld [vmem:[%s4658_s1 + $0x14] sm:$0xf] (!%p191_p9)  ;;  %v3146_v41 = vld [vmem:[%s4658_s1 + $0x18] sm:$0xf] (!%p191_p9) }
  0x10   : > { %3473 = vmatprep.subr.msk.mxu0 (!%p191_p9), %vm268_vm0, %v231_v1  ;;  %v3164_v50 = vld [vmem:[%s4658_s1 + $0x1c] sm:$0xf] (!%p191_p9)  ;;  %v3182_v56 = vld [vmem:[%s4658_s1 + $0x20] sm:$0xf] (!%p191_p9)  ;;  %vm1586_vm2 = vcmask (!%p191_p9), 130048   ;;  %vm1588_vm3 = vcmask (!%p191_p9), 123904  }
  0x11   : > { %v4000_v60 = vmov (!%p191_p9), 0.0   ;;  %v3193_v61 = vld [vmem:[%s4660_s3 + $0x10] sm:$0xff] (!%p191_p9)  ;;  %v3194_v62 = vld [vmem:[%s4660_s3 + $0x18] sm:$0xff] (!%p191_p9)  ;;  %s215_s23 = sand.u32 (!%p191_p9), 1, %s3990_s19   ;;  %vm2956_vm4 = vcmask (!%p191_p9), 261120   ;;  %s3287_s7 = sshll.u32 (!%p191_p9), %s4055_s22, 10 }
  0x12   : > { %1592 = vst.msk [vmem:[#allocation2 + $0x20] sm:$0xff] (!%p191_p9), %vm1586_vm2, %v4000_v60  ;;  %1587 = vst.msk [vmem:[#allocation2] sm:$0xff] (!%p191_p9), %vm1586_vm2, %v4000_v60  ;;  %v3729_v63 = vpack.c.bf16 (!%p191_p9), %v3194_v62, %v3193_v61  ;;  %v3241_v61 = vld [vmem:[%s4660_s3 + $0x50] sm:$0xff] (!%p191_p9)  ;;  %v3242_v62 = vld [vmem:[%s4660_s3 + $0x58] sm:$0xff] (!%p191_p9)  ;;  %s3045_s30 = sshll.u32 (!%p191_p9), %s215_s23, 6  ;;  %s4608_s11 = scalar_lea.hbm (!%p191_p9), %s4662_s5, %s3287_s7 }
  0x13   : > { %1593 = vst.msk [vmem:[#allocation2 + $0x28] sm:$0x3] (!%p191_p9), %vm1588_vm3, %v4000_v60  ;;  %1589 = vst.msk [vmem:[#allocation2 + $0x8] sm:$0x3] (!%p191_p9), %vm1588_vm3, %v4000_v60  ;;  %s217_s6 = scalar_lea.vmem (!%p191_p9), [#allocation3], %s3045_s30 }
  0x14   : > { %1590 = vst.msk [vmem:[#allocation2 + $0x10] sm:$0xff] (!%p191_p9), %vm1586_vm2, %v4000_v60  ;;  %1594 = vst.msk [vmem:[#allocation2 + $0x30] sm:$0xff] (!%p191_p9), %vm1586_vm2, %v4000_v60  ;;  %3730 = vmatprep.subr.bf16.mxu1 (!%p191_p9), %v3729_v63  ;;  %s2979_s8 = sshll.u32 (!%p191_p9), %s217_s6, 4  ;;  %s4610_s8 = int_to_ptr.vmem [resolvable:$true] %s2979_s8 }
  0x15   : > { %s219_s9 = scalar_select %p218_p10, %s4055_s22, 1  ;;  %1591 = vst.msk [vmem:[#allocation2 + $0x18] sm:$0x3] %vm1588_vm3, %v4000_v60  ;;  %1595 = vst.msk [vmem:[#allocation2 + $0x38] sm:$0x3] %vm1588_vm3, %v4000_v60  ;;  %3732 = vmatpush3.bf16.msra.mxu1 %v3729_v63  ;;  %v3749_v63 = vpack.c.bf16 %v3242_v62, %v3241_v61 }
  0x16   : > { %1596 = vst.msk [vmem:[#allocation2 + $0x40] sm:$0xff] %vm1586_vm2, %v4000_v60  ;;  %1598 = vst.msk [vmem:[#allocation2 + $0x50] sm:$0xff] %vm1586_vm2, %v4000_v60  ;;  %s4616_s22 = scalar_lea.sflag [#allocation4], %s215_s23  ;;  %s3936_s12 = scalar_lea.vmem %s4610_s8, 1024 }
  0x17   : > { %s3893_s10 = smul.u32 576, %s219_s9  ;;  %1597 = vst.msk [vmem:[#allocation2 + $0x48] sm:$0x3] %vm1588_vm3, %v4000_v60  ;;  %1599 = vst.msk [vmem:[#allocation2 + $0x58] sm:$0x3] %vm1588_vm3, %v4000_v60  ;;  %p3937_p11 = scmp.ne.s32.totalorder %s4610_s8, %s3936_s12 }
  0x18   : > { %1600 = vst.msk [vmem:[#allocation2 + $0x60] sm:$0xff] %vm1586_vm2, %v4000_v60  ;;  %1602 = vst.msk [vmem:[#allocation2 + $0x70] sm:$0xff] %vm1586_vm2, %v4000_v60 }
  0x19   : > { %s4096_s13 = scalar_lea.vmem %s4657_s0, %s3893_s10  ;;  %1601 = vst.msk [vmem:[#allocation2 + $0x68] sm:$0x3] %vm1588_vm3, %v4000_v60  ;;  %1603 = vst.msk [vmem:[#allocation2 + $0x78] sm:$0x3] %vm1588_vm3, %v4000_v60  ;;  %p3938_p12 = pnand %p3937_p11, %p4072_p5 }
  0x1a   : > { %v3047_v2 = vld [vmem:[%s4096_s13 + $0x90] sm:$0xff]  ;;  %v4100_v3 = vld [vmem:[%s4096_s13 + $0xa0] sm:$0xff]  ;;  %1604 = vst.msk [vmem:[#allocation2 + $0x80] sm:$0xff] %vm1586_vm2, %v4000_v60  ;;  %1606 = vst.msk [vmem:[#allocation2 + $0x90] sm:$0xff] %vm1586_vm2, %v4000_v60 }
  0x1b   : > { %v4103_v4 = vld [vmem:[%s4096_s13 + $0xb0] sm:$0xff]  ;;  %3461 = vmatprep.mubr.msk.f32.mxu0 %vm243_vm1, %v3047_v2  ;;  %v4115_v6 = vld [vmem:[%s4096_s13 + $0xc0] sm:$0xff]  ;;  %1605 = vst.msk [vmem:[#allocation2 + $0x88] sm:$0x3] %vm1588_vm3, %v4000_v60  ;;  %1607 = vst.msk [vmem:[#allocation2 + $0x98] sm:$0x3] %vm1588_vm3, %v4000_v60  ;;  %p3939_p13 = pneg %p3938_p12 }
  0x1c   : > { %3462 = vmatmul.mubr.msk.f32.vlgmr.msra.gmra.mrb[0].mxu0 %vm243_vm1, %v4100_v3  ;;  %v4118_v7 = vld [vmem:[%s4096_s13 + $0xd0] sm:$0xff]  ;;  %v4126_v8 = vld [vmem:[%s4096_s13 + $0xe0] sm:$0xff]  ;;  %v1626_v2 = vld [vmem:[%s4660_s3 + $0x8] sm:$0xff] }
  0x1d   : > { %3474 = vmatpush3.msk.msra.mxu0 %vm268_vm0, %v231_v1  ;;  %3464 = vmatprep.mubr.msk.f32.mxu0 %vm243_vm1, %v4103_v4  ;;  %v4129_v9 = vld [vmem:[%s4096_s13 + $0xf0] sm:$0xff]  ;;  %v4136_v10 = vld [vmem:[%s4096_s13 + $0x100] sm:$0xff] }
  0x1e   : > { %3487 = vmatprep.subr.msk.mxu0 %vm268_vm0, %v3074_v5  ;;  %v223_v11 = vld [vmem:[%s4096_s13] sm:$0xff]  ;;  %v4143_v12 = vld [vmem:[%s4096_s13 + $0x10] sm:$0xff] }
  0x1f   : > { %v4146_v13 = vld [vmem:[%s4096_s13 + $0x20] sm:$0xff]  ;;  %v4157_v15 = vld [vmem:[%s4096_s13 + $0x30] sm:$0xff] }
  0x20   : > { %3465 = vmatmul.mubr.msk.f32.gmra.mrb[2].mxu0 %vm243_vm1, %v4115_v6  ;;  %v4160_v16 = vld [vmem:[%s4096_s13 + $0x40] sm:$0xff]  ;;  %v4168_v17 = vld [vmem:[%s4096_s13 + $0x50] sm:$0xff] }
  0x21   : > { %3467 = vmatprep.mubr.msk.f32.mxu0 %vm243_vm1, %v4118_v7  ;;  %v4171_v18 = vld [vmem:[%s4096_s13 + $0x60] sm:$0xff]  ;;  %v4178_v19 = vld [vmem:[%s4096_s13 + $0x70] sm:$0xff] }
  0x22   : > { %v509_v20 = vld [vmem:[%s4096_s13 + $0x1] sm:$0xff]  ;;  %v4185_v21 = vld [vmem:[%s4096_s13 + $0x11] sm:$0xff] }
  0x23   : > { %v4188_v22 = vld [vmem:[%s4096_s13 + $0x21] sm:$0xff]  ;;  %v4199_v24 = vld [vmem:[%s4096_s13 + $0x31] sm:$0xff] }
  0x24   : > { %3468 = vmatmul.mubr.msk.f32.gmra.mrb[4].mxu0 %vm243_vm1, %v4126_v8  ;;  %v4202_v25 = vld [vmem:[%s4096_s13 + $0x41] sm:$0xff]  ;;  %v4210_v26 = vld [vmem:[%s4096_s13 + $0x51] sm:$0xff] }
  0x25   : > { %3470 = vmatprep.mubr.msk.f32.mxu0 %vm243_vm1, %v4129_v9  ;;  %v4213_v27 = vld [vmem:[%s4096_s13 + $0x61] sm:$0xff]  ;;  %v4220_v28 = vld [vmem:[%s4096_s13 + $0x71] sm:$0xff] }
  0x26   : > { %v3084_v29 = vld [vmem:[%s4096_s13 + $0x120] sm:$0xff]  ;;  %v3085_v30 = vld [vmem:[%s4096_s13 + $0x130] sm:$0xff] }
  0x27   : > { %v3086_v31 = vld [vmem:[%s4096_s13 + $0x140] sm:$0xff]  ;;  %v3087_v33 = vld [vmem:[%s4096_s13 + $0x150] sm:$0xff] }
  0x28   : > { %3471 = vmatmul.mubr.msk.f32.gmra.mrb[6].mxu0 %vm243_vm1, %v4136_v10  ;;  %v3088_v34 = vld [vmem:[%s4096_s13 + $0x160] sm:$0xff]  ;;  %v3089_v35 = vld [vmem:[%s4096_s13 + $0x170] sm:$0xff] }
  0x29   : > { %3475 = vmatprep.mubr.msk.f32.mxu0 %vm243_vm1, %v223_v11  ;;  %v3090_v36 = vld [vmem:[%s4096_s13 + $0x180] sm:$0xff]  ;;  %v3091_v37 = vld [vmem:[%s4096_s13 + $0x190] sm:$0xff] }
  0x2a   : > { %v3102_v38 = vld [vmem:[%s4096_s13 + $0x1b0] sm:$0xff]  ;;  %v3103_v39 = vld [vmem:[%s4096_s13 + $0x1c0] sm:$0xff] }
  0x2b   : > { %v3104_v40 = vld [vmem:[%s4096_s13 + $0x1d0] sm:$0xff]  ;;  %v3105_v42 = vld [vmem:[%s4096_s13 + $0x1e0] sm:$0xff] }
  0x2c   : > { %3476 = vmatmul.mubr.msk.f32.vlgmr.msra.gmra.mrb[0].mxu0 %vm243_vm1, %v4143_v12  ;;  %v3106_v43 = vld [vmem:[%s4096_s13 + $0x1f0] sm:$0xff]  ;;  %v3107_v44 = vld [vmem:[%s4096_s13 + $0x200] sm:$0xff] }
  0x2d   : > { %3488 = vmatpush3.msk.msra.mxu0 %vm268_vm0, %v3074_v5  ;;  %3478 = vmatprep.mubr.msk.f32.mxu0 %vm243_vm1, %v4146_v13  ;;  %v3108_v45 = vld [vmem:[%s4096_s13 + $0x210] sm:$0xff]  ;;  %v3109_v46 = vld [vmem:[%s4096_s13 + $0x220] sm:$0xff] }
  0x2e   : > { %3501 = vmatprep.subr.msk.mxu0 %vm268_vm0, %v3092_v14  ;;  %v3120_v47 = vld [vmem:[%s4096_s13 + $0x121] sm:$0xff]  ;;  %v3121_v48 = vld [vmem:[%s4096_s13 + $0x131] sm:$0xff] }
  0x2f   : > { %v3122_v49 = vld [vmem:[%s4096_s13 + $0x141] sm:$0xff]  ;;  %v3123_v51 = vld [vmem:[%s4096_s13 + $0x151] sm:$0xff] }
  0x30   : > { %3479 = vmatmul.mubr.msk.f32.gmra.mrb[2].mxu0 %vm243_vm1, %v4157_v15  ;;  %v3124_v52 = vld [vmem:[%s4096_s13 + $0x161] sm:$0xff]  ;;  %v3125_v53 = vld [vmem:[%s4096_s13 + $0x171] sm:$0xff] }
  0x31   : > { %3481 = vmatprep.mubr.msk.f32.mxu0 %vm243_vm1, %v4160_v16  ;;  %v3126_v54 = vld [vmem:[%s4096_s13 + $0x181] sm:$0xff]  ;;  %v3127_v55 = vld [vmem:[%s4096_s13 + $0x191] sm:$0xff] }
  0x32   : > { %v3145_v57 = vld [vmem:[%s4096_s13 + $0x80] sm:$0xff]  ;;  %v3163_v58 = vld [vmem:[%s4096_s13 + $0x110] sm:$0xff] }
  0x33   : > { %v3181_v59 = vld [vmem:[%s4096_s13 + $0x81] sm:$0xff]  ;;  %s4001_s13 = smov [#allocation3]  }
  0x34   : > { %3482 = vmatmul.mubr.msk.f32.gmra.mrb[4].mxu0 %vm243_vm1, %v4168_v17  ;;  %v1627_v0 = vld [vmem:[#allocation2 + $0x1] sm:$0xff]  ;;  %s3940_s14 = sshll.u32 %s4001_s13, 4  ;;  %s3941_s14 = int_to_ptr.vmem [resolvable:$false] %s3940_s14 }
  0x35   : > { %3484 = vmatprep.mubr.msk.f32.mxu0 %vm243_vm1, %v4171_v18  ;;  %3589 = vmatprep.mubr.msk.f32.mxu1 %vm1586_vm2, %v1627_v0  ;;  %v1625_v1 = vld [vmem:[%s4660_s3] sm:$0xff]  ;;  %s3942_s15 = scalar_lea.vmem %s3941_s14, 2048  ;;  %p3943_p0 = scmp.lt.s32.totalorder %s4610_s8, %s3941_s14 }
  0x36   : > { %p3944_p1 = scmp.lt.s32.totalorder %s3942_s15, %s3936_s12 }
  0x38   : > { %3485 = vmatmul.mubr.msk.f32.gmra.mrb[6].mxu0 %vm243_vm1, %v4178_v19  ;;  %p3945_p2 = por %p3944_p1, %p3943_p0 }
  0x39   : > { %3489 = vmatprep.mubr.msk.f32.mxu0 %vm243_vm1, %v509_v20  ;;  %v3211_v20 = vld [vmem:[%s4660_s3 + $0x20] sm:$0xff] }
  0x3a   : > { %p3946_p3 = pnand %p3945_p2, %p3939_p13 }
  0x3c   : > { %3490 = vmatmul.mubr.msk.f32.vlgmr.msra.gmra.mrb[0].mxu0 %vm243_vm1, %v4185_v21 }
  0x3d   : > { %3502 = vmatpush3.msk.msra.mxu0 %vm268_vm0, %v3092_v14  ;;  %3492 = vmatprep.mubr.msk.f32.mxu0 %vm243_vm1, %v4188_v22 }
  0x3e   : > { %3515 = vmatprep.subr.msk.mxu0 %vm268_vm0, %v3110_v23 }
  0x40   : > { %3493 = vmatmul.mubr.msk.f32.gmra.mrb[2].mxu0 %vm243_vm1, %v4199_v24 }
  0x41   : > { %3495 = vmatprep.mubr.msk.f32.mxu0 %vm243_vm1, %v4202_v25 }
  0x44   : > { %3496 = vmatmul.mubr.msk.f32.gmra.mrb[4].mxu0 %vm243_vm1, %v4210_v26 }
  0x45   : > { %3498 = vmatprep.mubr.msk.f32.mxu0 %vm243_vm1, %v4213_v27 }
  0x48   : > { %3499 = vmatmul.mubr.msk.f32.gmra.mrb[6].mxu0 %vm243_vm1, %v4220_v28 }
  0x49   : > { %3503 = vmatprep.mubr.msk.f32.mxu0 %vm243_vm1, %v3084_v29 }
  0x4c   : > { %3504 = vmatmul.mubr.msk.f32.vlgmr.msra.gmra.mrb[0].mxu0 %vm243_vm1, %v3085_v30 }
  0x4d   : > { %3516 = vmatpush3.msk.msra.mxu0 %vm268_vm0, %v3110_v23  ;;  %3506 = vmatprep.mubr.msk.f32.mxu0 %vm243_vm1, %v3086_v31 }
  0x4e   : > { %3529 = vmatprep.subr.msk.mxu0 %vm268_vm0, %v3128_v32 }
  0x50   : > { %3507 = vmatmul.mubr.msk.f32.gmra.mrb[2].mxu0 %vm243_vm1, %v3087_v33 }
  0x51   : > { %3509 = vmatprep.mubr.msk.f32.mxu0 %vm243_vm1, %v3088_v34 }
  0x54   : > { %3510 = vmatmul.mubr.msk.f32.gmra.mrb[4].mxu0 %vm243_vm1, %v3089_v35 }
  0x55   : > { %3512 = vmatprep.mubr.msk.f32.mxu0 %vm243_vm1, %v3090_v36 }
  0x58   : > { %3513 = vmatmul.mubr.msk.f32.gmra.mrb[6].mxu0 %vm243_vm1, %v3091_v37 }
  0x59   : > { %3517 = vmatprep.mubr.msk.f32.mxu0 %vm243_vm1, %v3102_v38  ;;  %v1617_v38 = vld [vmem:[#allocation2] sm:$0xff] }
  0x5c   : > { %3518 = vmatmul.mubr.msk.f32.vlgmr.msra.gmra.mrb[0].mxu0 %vm243_vm1, %v3103_v39 }
  0x5d   : > { %3530 = vmatpush3.msk.msra.mxu0 %vm268_vm0, %v3128_v32  ;;  %3520 = vmatprep.mubr.msk.f32.mxu0 %vm243_vm1, %v3104_v40  ;;  %v3221_v40 = vld [vmem:[%s4660_s3 + $0x30] sm:$0xff] }
  0x5e   : > { %3543 = vmatprep.subr.msk.mxu0 %vm268_vm0, %v3146_v41 }
  0x60   : > { %3521 = vmatmul.mubr.msk.f32.gmra.mrb[2].mxu0 %vm243_vm1, %v3105_v42 }
  0x61   : > { %3523 = vmatprep.mubr.msk.f32.mxu0 %vm243_vm1, %v3106_v43 }
  0x64   : > { %3524 = vmatmul.mubr.msk.f32.gmra.mrb[4].mxu0 %vm243_vm1, %v3107_v44 }
  0x65   : > { %3526 = vmatprep.mubr.msk.f32.mxu0 %vm243_vm1, %v3108_v45 }
  0x68   : > { %3527 = vmatmul.mubr.msk.f32.gmra.mrb[6].mxu0 %vm243_vm1, %v3109_v46 }
  0x69   : > { %3531 = vmatprep.mubr.msk.f32.mxu0 %vm243_vm1, %v3120_v47 }
  0x6c   : > { %3532 = vmatmul.mubr.msk.f32.vlgmr.msra.gmra.mrb[0].mxu0 %vm243_vm1, %v3121_v48 }
  0x6d   : > { %3544 = vmatpush3.msk.msra.mxu0 %vm268_vm0, %v3146_v41  ;;  %3534 = vmatprep.mubr.msk.f32.mxu0 %vm243_vm1, %v3122_v49  ;;  %v3222_v41 = vld [vmem:[%s4660_s3 + $0x38] sm:$0xff]  ;;  %v1896_v49 = vld [vmem:[#allocation2 + $0x2] sm:$0xff] }
  0x6e   : > { %3557 = vmatprep.subr.msk.mxu0 %vm268_vm0, %v3164_v50  ;;  %v3741_v42 = vpack.c.bf16 %v3222_v41, %v3221_v40 }
  0x70   : > { %3535 = vmatmul.mubr.msk.f32.gmra.mrb[2].mxu0 %vm243_vm1, %v3123_v51  ;;  %v3231_v51 = vld [vmem:[%s4660_s3 + $0x40] sm:$0xff] }
  0x71   : > { %3537 = vmatprep.mubr.msk.f32.mxu0 %vm243_vm1, %v3124_v52  ;;  %v3232_v52 = vld [vmem:[%s4660_s3 + $0x48] sm:$0xff] }
  0x74   : > { %3538 = vmatmul.mubr.msk.f32.gmra.mrb[4].mxu0 %vm243_vm1, %v3125_v53  ;;  %v3745_v53 = vpack.c.bf16 %v3232_v52, %v3231_v51 }
  0x75   : > { %3540 = vmatprep.mubr.msk.f32.mxu0 %vm243_vm1, %v3126_v54 }
  0x78   : > { %3541 = vmatmul.mubr.msk.f32.gmra.mrb[6].mxu0 %vm243_vm1, %v3127_v55 }
  0x79   : > { %3545 = vmatprep.mubr.msk.f32.mxu0 %vm243_vm1, %v4143_v12 }
  0x7c   : > { %3546 = vmatmul.mubr.msk.f32.vlgmr.msra.gmra.mrb[0].mxu0 %vm243_vm1, %v4146_v13 }
  0x7d   : > { %3558 = vmatpush3.msk.msra.mxu0 %vm268_vm0, %v3164_v50  ;;  %3548 = vmatprep.mubr.msk.f32.mxu0 %vm243_vm1, %v4157_v15 }
  0x7e   : > { %3571 = vmatprep.subr.msk.mxu0 %vm268_vm0, %v3182_v56 }
  0x80   : > { %3549 = vmatmul.mubr.msk.f32.gmra.mrb[2].mxu0 %vm243_vm1, %v4160_v16 }
  0x81   : > { %3551 = vmatprep.mubr.msk.f32.mxu0 %vm243_vm1, %v4168_v17 }
  0x84   : > { %3552 = vmatmul.mubr.msk.f32.gmra.mrb[4].mxu0 %vm243_vm1, %v4171_v18 }
  0x85   : > { %3554 = vmatprep.mubr.msk.f32.mxu0 %vm243_vm1, %v4178_v19 }
  0x88   : > { %3555 = vmatmul.mubr.msk.f32.gmra.mrb[6].mxu0 %vm243_vm1, %v3145_v57 }
  0x89   : > { %3559 = vmatprep.mubr.msk.f32.mxu0 %vm243_vm1, %v4100_v3  ;;  %v3733_v3 = vpack.c.bf16 %v1626_v2, %v1625_v1  ;;  %v3251_v1 = vld [vmem:[%s4660_s3 + $0x60] sm:$0xff]  ;;  %v3252_v2 = vld [vmem:[%s4660_s3 + $0x68] sm:$0xff] }
  0x8b   : > { %3734 = vmatprep.subr.bf16.mxu1 %v3733_v3 }
  0x8c   : > { %3560 = vmatmul.mubr.msk.f32.vlgmr.msra.gmra.mrb[0].mxu0 %vm243_vm1, %v4103_v4  ;;  %v3192_v4 = vld [vmem:[%s4659_s2] ss:$0 sm:$0xff] }
  0x8d   : > { %3572 = vmatpush3.msk.msra.mxu0 %vm268_vm0, %v3182_v56  ;;  %3562 = vmatprep.mubr.msk.f32.mxu0 %vm243_vm1, %v4115_v6 }
  0x90   : > { %3563 = vmatmul.mubr.msk.f32.gmra.mrb[2].mxu0 %vm243_vm1, %v4118_v7 }
  0x91   : > { %3565 = vmatprep.mubr.msk.f32.mxu0 %vm243_vm1, %v4126_v8 }
  0x94   : > { %3566 = vmatmul.mubr.msk.f32.gmra.mrb[4].mxu0 %vm243_vm1, %v4129_v9 }
  0x95   : > { %3568 = vmatprep.mubr.msk.f32.mxu0 %vm243_vm1, %v4136_v10 }
  0x98   : > { %3569 = vmatmul.mubr.msk.f32.gmra.mrb[6].mxu0 %vm243_vm1, %v3163_v58 }
  0x99   : > { %3573 = vmatprep.mubr.msk.f32.mxu0 %vm243_vm1, %v4185_v21  ;;  %v3212_v21 = vld [vmem:[%s4660_s3 + $0x28] sm:$0xff] }
  0x9c   : > { %3574 = vmatmul.mubr.msk.f32.vlgmr.msra.gmra.mrb[0].mxu0 %vm243_vm1, %v4188_v22 }
  0x9d   : > { %3576 = vmatprep.mubr.msk.f32.mxu0 %vm243_vm1, %v4199_v24 }
  0xa0   : > { %3577 = vmatmul.mubr.msk.f32.gmra.mrb[2].mxu0 %vm243_vm1, %v4202_v25 }
  0xa1   : > { %3579 = vmatprep.mubr.msk.f32.mxu0 %vm243_vm1, %v4210_v26  ;;  %v3737_v26 = vpack.c.bf16 %v3212_v21, %v3211_v20 }
  0xa4   : > { %3580 = vmatmul.mubr.msk.f32.gmra.mrb[4].mxu0 %vm243_vm1, %v4213_v27 }
  0xa5   : > { %3582 = vmatprep.mubr.msk.f32.mxu0 %vm243_vm1, %v4220_v28 }
  0xa8   : > { %3583 = vmatmul.mubr.msk.f32.gmra.mrb[6].mxu0 %vm243_vm1, %v3181_v59 }
 0x16f   : > { %v3575_v5 = vpop.f32.mrb[0].mxu0 }
 0x170   : > { %v1571_v6 = vadd.f32 %v3575_v5, %v3192_v4  ;;  %v1516_v7 = vpop.f32.mrb[1].mxu0  ;;  %v3261_v5 = vld [vmem:[%s4660_s3 + $0x70] sm:$0xff] }
 0x171   : > { %v1570_v8 = vadd.f32 %v3192_v4, %v1516_v7 }
 0x172   : > { %v1579_v9 = vmax.f32 %v1571_v6, 0.0  ;;  %v3262_v6 = vld [vmem:[%s4660_s3 + $0x78] sm:$0xff] }
 0x173   : > { %v1578_v10 = vmax.f32 %v1570_v8, 0.0  ;;  %v3578_v11 = vpop.f32.mrb[2].mxu0  ;;  %v3757_v7 = vpack.c.bf16 %v3262_v6, %v3261_v5 }
 0x174   : > { %1610 = vst.msk [vmem:[#allocation2 + $0x21] sm:$0xff] %vm1586_vm2, %v1579_v9  ;;  %v1573_v12 = vadd.f32 %v3578_v11, %v3192_v4  ;;  %v1526_v13 = vpop.f32.mrb[3].mxu0  ;;  %v3271_v9 = vld [vmem:[%s4660_s3 + $0x80] sm:$0xff] }
 0x175   : > { %1609 = vst.msk [vmem:[#allocation2 + $0x11] sm:$0xff] %vm1586_vm2, %v1578_v10  ;;  %v1572_v14 = vadd.f32 %v3192_v4, %v1526_v13  ;;  %v3272_v10 = vld [vmem:[%s4660_s3 + $0x88] sm:$0xff]  ;;  %v2644_v13 = vld [vmem:[#allocation2 + $0x91] sm:$0xff] }
 0x176   : > { %v1581_v15 = vmax.f32 %v1573_v12, 0.0  ;;  %v3761_v11 = vpack.c.bf16 %v3272_v10, %v3271_v9  ;;  %v2496_v12 = vld [vmem:[#allocation2 + $0x90] sm:$0xff] }
 0x177   : > { %v1580_v16 = vmax.f32 %v1572_v14, 0.0  ;;  %v3581_v17 = vpop.f32.mrb[4].mxu0  ;;  %v2792_v14 = vld [vmem:[#allocation2 + $0x92] sm:$0xff] }
 0x178   : > { %1612 = vst.msk [vmem:[#allocation2 + $0x41] sm:$0xff] %vm1586_vm2, %v1581_v15  ;;  %v1575_v18 = vadd.f32 %v3581_v17, %v3192_v4  ;;  %v1536_v19 = vpop.f32.mrb[5].mxu0  ;;  %v3281_v15 = vld [vmem:[%s4661_s4] ss:$0 sm:$0xff] }
 0x179   : > { %1611 = vst.msk [vmem:[#allocation2 + $0x31] sm:$0xff] %vm1586_vm2, %v1580_v16  ;;  %v1574_v22 = vadd.f32 %v3192_v4, %v1536_v19 }
 0x17a   : > { %v1583_v23 = vmax.f32 %v1575_v18, 0.0 }
 0x17b   : > { %v1582_v24 = vmax.f32 %v1574_v22, 0.0  ;;  %v3584_v25 = vpop.f32.mrb[6].mxu0  ;;  %v4393_v31 = vld [vmem:[#allocation2 + $0x21] sm:$0xff] }
 0x17c   : > { %1614 = vst.msk [vmem:[#allocation2 + $0x61] sm:$0xff] %vm1586_vm2, %v1583_v23  ;;  %v1577_v27 = vadd.f32 %v3584_v25, %v3192_v4  ;;  %v1546_v28 = vpop.f32.mrb[7].mxu0  ;;  %v4388_v29 = vld [vmem:[#allocation2 + $0x11] sm:$0xff]  ;;  %v4427_v44 = vld [vmem:[#allocation2 + $0x20] sm:$0xff] }
 0x17d   : > { %1613 = vst.msk [vmem:[#allocation2 + $0x51] sm:$0xff] %vm1586_vm2, %v1582_v24  ;;  %v1576_v30 = vadd.f32 %v3192_v4, %v1546_v28  ;;  %3590 = vmatmul.mubr.msk.f32.vlgmr.msra.gmra.mrb[0].mxu1 %vm1586_vm2, %v4388_v29  ;;  %v1618_v43 = vld [vmem:[#allocation2 + $0x10] sm:$0xff]  ;;  %v4459_v55 = vld [vmem:[#allocation2 + $0x22] sm:$0xff] }
 0x17e   : > { %v1585_v32 = vmax.f32 %v1577_v27, 0.0  ;;  %3736 = vmatpush3.bf16.msra.mxu1 %v3733_v3  ;;  %3592 = vmatprep.mubr.msk.f32.mxu1 %vm1586_vm2, %v4393_v31  ;;  %v1897_v54 = vld [vmem:[#allocation2 + $0x12] sm:$0xff]  ;;  %v3753_v3 = vpack.c.bf16 %v3252_v2, %v3251_v1 }
 0x17f   : > { %v1584_v33 = vmax.f32 %v1576_v30, 0.0  ;;  %3738 = vmatprep.subr.bf16.mxu1 %v3737_v26  ;;  %v4403_v35 = vld [vmem:[#allocation2 + $0x41] sm:$0xff] }
 0x180   : > { %1616 = vst.msk [vmem:[#allocation2 + $0x81] sm:$0xff] %vm1586_vm2, %v1585_v32  ;;  %v4398_v34 = vld [vmem:[#allocation2 + $0x31] sm:$0xff]  ;;  %v4435_v46 = vld [vmem:[#allocation2 + $0x40] sm:$0xff] }
 0x181   : > { %1615 = vst.msk [vmem:[#allocation2 + $0x71] sm:$0xff] %vm1586_vm2, %v1584_v33  ;;  %3593 = vmatmul.mubr.msk.f32.gmra.mrb[2].mxu1 %vm1586_vm2, %v4398_v34  ;;  %v4431_v45 = vld [vmem:[#allocation2 + $0x30] sm:$0xff]  ;;  %v4467_v57 = vld [vmem:[#allocation2 + $0x42] sm:$0xff] }
 0x182   : > { %3595 = vmatprep.mubr.msk.f32.mxu1 %vm1586_vm2, %v4403_v35  ;;  %v4463_v56 = vld [vmem:[#allocation2 + $0x32] sm:$0xff] }
 0x183   : > { %v4411_v37 = vld [vmem:[#allocation2 + $0x61] sm:$0xff] }
 0x184   : > { %v4407_v36 = vld [vmem:[#allocation2 + $0x51] sm:$0xff]  ;;  %v4443_v48 = vld [vmem:[#allocation2 + $0x60] sm:$0xff] }
 0x185   : > { %3596 = vmatmul.mubr.msk.f32.gmra.mrb[4].mxu1 %vm1586_vm2, %v4407_v36  ;;  %v4439_v47 = vld [vmem:[#allocation2 + $0x50] sm:$0xff]  ;;  %v4475_v59 = vld [vmem:[#allocation2 + $0x62] sm:$0xff] }
 0x186   : > { %3598 = vmatprep.mubr.msk.f32.mxu1 %vm1586_vm2, %v4411_v37  ;;  %v4471_v58 = vld [vmem:[#allocation2 + $0x52] sm:$0xff] }
 0x187   : > { %v2051_v0 = vld [vmem:[#allocation2 + $0x80] sm:$0xff] }
 0x188   : > { %v4415_v39 = vld [vmem:[#allocation2 + $0x71] sm:$0xff]  ;;  %v2199_v4 = vld [vmem:[#allocation2 + $0x81] sm:$0xff] }
 0x189   : > { %3599 = vmatmul.mubr.msk.f32.gmra.mrb[6].mxu1 %vm1586_vm2, %v4415_v39  ;;  %v4447_v50 = vld [vmem:[#allocation2 + $0x70] sm:$0xff]  ;;  %v2347_v8 = vld [vmem:[#allocation2 + $0x82] sm:$0xff] }
 0x18a   : > { %3605 = vmatprep.mubr.msk.f32.mxu1 %vm1586_vm2, %v1617_v38  ;;  %v4479_v60 = vld [vmem:[#allocation2 + $0x72] sm:$0xff] }
 0x18d   : > { %3606 = vmatmul.mubr.msk.f32.vlgmr.msra.gmra.mrb[0].mxu1 %vm1586_vm2, %v1618_v43 }
 0x18e   : > { %3740 = vmatpush3.bf16.msra.mxu1 %v3737_v26  ;;  %3608 = vmatprep.mubr.msk.f32.mxu1 %vm1586_vm2, %v4427_v44 }
 0x18f   : > { %3742 = vmatprep.subr.bf16.mxu1 %v3741_v42 }
 0x191   : > { %3609 = vmatmul.mubr.msk.f32.gmra.mrb[2].mxu1 %vm1586_vm2, %v4431_v45 }
 0x192   : > { %3611 = vmatprep.mubr.msk.f32.mxu1 %vm1586_vm2, %v4435_v46 }
 0x195   : > { %3612 = vmatmul.mubr.msk.f32.gmra.mrb[4].mxu1 %vm1586_vm2, %v4439_v47 }
 0x196   : > { %3614 = vmatprep.mubr.msk.f32.mxu1 %vm1586_vm2, %v4443_v48 }
 0x199   : > { %3615 = vmatmul.mubr.msk.f32.gmra.mrb[6].mxu1 %vm1586_vm2, %v4447_v50 }
 0x19a   : > { %3621 = vmatprep.mubr.msk.f32.mxu1 %vm1586_vm2, %v1896_v49 }
 0x19d   : > { %3622 = vmatmul.mubr.msk.f32.vlgmr.msra.gmra.mrb[0].mxu1 %vm1586_vm2, %v1897_v54 }
 0x19e   : > { %3744 = vmatpush3.bf16.msra.mxu1 %v3741_v42  ;;  %3624 = vmatprep.mubr.msk.f32.mxu1 %vm1586_vm2, %v4459_v55 }
 0x19f   : > { %3746 = vmatprep.subr.bf16.mxu1 %v3745_v53 }
 0x1a1   : > { %3625 = vmatmul.mubr.msk.f32.gmra.mrb[2].mxu1 %vm1586_vm2, %v4463_v56 }
 0x1a2   : > { %3627 = vmatprep.mubr.msk.f32.mxu1 %vm1586_vm2, %v4467_v57 }
 0x1a5   : > { %3628 = vmatmul.mubr.msk.f32.gmra.mrb[4].mxu1 %vm1586_vm2, %v4471_v58 }
 0x1a6   : > { %3630 = vmatprep.mubr.msk.f32.mxu1 %vm1586_vm2, %v4475_v59 }
 0x1a9   : > { %3631 = vmatmul.mubr.msk.f32.gmra.mrb[6].mxu1 %vm1586_vm2, %v4479_v60 }
 0x1aa   : > { %3637 = vmatprep.mubr.msk.f32.mxu1 %vm1586_vm2, %v1618_v43 }
 0x1ad   : > { %3638 = vmatmul.mubr.msk.f32.vlgmr.msra.gmra.mrb[0].mxu1 %vm1586_vm2, %v4427_v44 }
 0x1ae   : > { %3748 = vmatpush3.bf16.msra.mxu1 %v3745_v53  ;;  %3640 = vmatprep.mubr.msk.f32.mxu1 %vm1586_vm2, %v4431_v45 }
 0x1af   : > { %3750 = vmatprep.subr.bf16.mxu1 %v3749_v63 }
 0x1b1   : > { %3641 = vmatmul.mubr.msk.f32.gmra.mrb[2].mxu1 %vm1586_vm2, %v4435_v46 }
 0x1b2   : > { %3643 = vmatprep.mubr.msk.f32.mxu1 %vm1586_vm2, %v4439_v47 }
 0x1b5   : > { %3644 = vmatmul.mubr.msk.f32.gmra.mrb[4].mxu1 %vm1586_vm2, %v4443_v48 }
 0x1b6   : > { %3646 = vmatprep.mubr.msk.f32.mxu1 %vm1586_vm2, %v4447_v50 }
 0x1b9   : > { %3647 = vmatmul.mubr.msk.f32.gmra.mrb[6].mxu1 %vm1586_vm2, %v2051_v0 }
 0x1ba   : > { %3653 = vmatprep.mubr.msk.f32.mxu1 %vm1586_vm2, %v4388_v29 }
 0x1bd   : > { %3654 = vmatmul.mubr.msk.f32.vlgmr.msra.gmra.mrb[0].mxu1 %vm1586_vm2, %v4393_v31 }
 0x1be   : > { %3752 = vmatpush3.bf16.msra.mxu1 %v3749_v63  ;;  %3656 = vmatprep.mubr.msk.f32.mxu1 %vm1586_vm2, %v4398_v34 }
 0x1bf   : > { %3754 = vmatprep.subr.bf16.mxu1 %v3753_v3 }
 0x1c1   : > { %3657 = vmatmul.mubr.msk.f32.gmra.mrb[2].mxu1 %vm1586_vm2, %v4403_v35 }
 0x1c2   : > { %3659 = vmatprep.mubr.msk.f32.mxu1 %vm1586_vm2, %v4407_v36 }
 0x1c5   : > { %3660 = vmatmul.mubr.msk.f32.gmra.mrb[4].mxu1 %vm1586_vm2, %v4411_v37 }
 0x1c6   : > { %3662 = vmatprep.mubr.msk.f32.mxu1 %vm1586_vm2, %v4415_v39 }
 0x1c9   : > { %3663 = vmatmul.mubr.msk.f32.gmra.mrb[6].mxu1 %vm1586_vm2, %v2199_v4 }
 0x1ca   : > { %3669 = vmatprep.mubr.msk.f32.mxu1 %vm1586_vm2, %v1897_v54 }
 0x1cd   : > { %3670 = vmatmul.mubr.msk.f32.vlgmr.msra.gmra.mrb[0].mxu1 %vm1586_vm2, %v4459_v55 }
 0x1ce   : > { %3756 = vmatpush3.bf16.msra.mxu1 %v3753_v3  ;;  %3672 = vmatprep.mubr.msk.f32.mxu1 %vm1586_vm2, %v4463_v56 }
 0x1cf   : > { %3758 = vmatprep.subr.bf16.mxu1 %v3757_v7 }
 0x1d1   : > { %3673 = vmatmul.mubr.msk.f32.gmra.mrb[2].mxu1 %vm1586_vm2, %v4467_v57 }
 0x1d2   : > { %3675 = vmatprep.mubr.msk.f32.mxu1 %vm1586_vm2, %v4471_v58 }
 0x1d5   : > { %3676 = vmatmul.mubr.msk.f32.gmra.mrb[4].mxu1 %vm1586_vm2, %v4475_v59 }
 0x1d6   : > { %3678 = vmatprep.mubr.msk.f32.mxu1 %vm1586_vm2, %v4479_v60 }
 0x1d9   : > { %3679 = vmatmul.mubr.msk.f32.gmra.mrb[6].mxu1 %vm1586_vm2, %v2347_v8 }
 0x1da   : > { %3685 = vmatprep.mubr.msk.f32.mxu1 %vm1586_vm2, %v4427_v44 }
 0x1dd   : > { %3686 = vmatmul.mubr.msk.f32.vlgmr.msra.gmra.mrb[0].mxu1 %vm1586_vm2, %v4431_v45 }
 0x1de   : > { %3760 = vmatpush3.bf16.msra.mxu1 %v3757_v7  ;;  %3688 = vmatprep.mubr.msk.f32.mxu1 %vm1586_vm2, %v4435_v46 }
 0x1df   : > { %3762 = vmatprep.subr.bf16.mxu1 %v3761_v11 }
 0x1e1   : > { %3689 = vmatmul.mubr.msk.f32.gmra.mrb[2].mxu1 %vm1586_vm2, %v4439_v47 }
 0x1e2   : > { %3691 = vmatprep.mubr.msk.f32.mxu1 %vm1586_vm2, %v4443_v48 }
 0x1e5   : > { %3692 = vmatmul.mubr.msk.f32.gmra.mrb[4].mxu1 %vm1586_vm2, %v4447_v50 }
 0x1e6   : > { %3694 = vmatprep.mubr.msk.f32.mxu1 %vm1586_vm2, %v2051_v0 }
 0x1e9   : > { %3695 = vmatmul.mubr.msk.f32.gmra.mrb[6].mxu1 %vm1586_vm2, %v2496_v12 }
 0x1ea   : > { %3701 = vmatprep.mubr.msk.f32.mxu1 %vm1586_vm2, %v4393_v31 }
 0x1ed   : > { %3702 = vmatmul.mubr.msk.f32.vlgmr.msra.gmra.mrb[0].mxu1 %vm1586_vm2, %v4398_v34 }
 0x1ee   : > { %3764 = vmatpush3.bf16.msra.mxu1 %v3761_v11  ;;  %3704 = vmatprep.mubr.msk.f32.mxu1 %vm1586_vm2, %v4403_v35 }
 0x1f1   : > { %3705 = vmatmul.mubr.msk.f32.gmra.mrb[2].mxu1 %vm1586_vm2, %v4407_v36 }
 0x1f2   : > { %3707 = vmatprep.mubr.msk.f32.mxu1 %vm1586_vm2, %v4411_v37 }
 0x1f5   : > { %3708 = vmatmul.mubr.msk.f32.gmra.mrb[4].mxu1 %vm1586_vm2, %v4415_v39 }
 0x1f6   : > { %3710 = vmatprep.mubr.msk.f32.mxu1 %vm1586_vm2, %v2199_v4 }
 0x1f9   : > { %3711 = vmatmul.mubr.msk.f32.gmra.mrb[6].mxu1 %vm1586_vm2, %v2644_v13 }
 0x1fa   : > { %3717 = vmatprep.mubr.msk.f32.mxu1 %vm1586_vm2, %v4459_v55 }
 0x1fd   : > { %3718 = vmatmul.mubr.msk.f32.vlgmr.msra.gmra.mrb[0].mxu1 %vm1586_vm2, %v4463_v56 }
 0x1fe   : > { %3720 = vmatprep.mubr.msk.f32.mxu1 %vm1586_vm2, %v4467_v57 }
 0x201   : > { %3721 = vmatmul.mubr.msk.f32.gmra.mrb[2].mxu1 %vm1586_vm2, %v4471_v58 }
 0x202   : > { %3723 = vmatprep.mubr.msk.f32.mxu1 %vm1586_vm2, %v4475_v59 }
 0x205   : > { %3724 = vmatmul.mubr.msk.f32.gmra.mrb[4].mxu1 %vm1586_vm2, %v4479_v60 }
 0x206   : > { %3726 = vmatprep.mubr.msk.f32.mxu1 %vm1586_vm2, %v2347_v8 }
 0x209   : > { %3727 = vmatmul.mubr.msk.f32.gmra.mrb[6].mxu1 %vm1586_vm2, %v2792_v14 }
 0x2d0   : > { %v3719_v16 = vpop.f32.mrb[0].mxu1 }
 0x2d1   : > { %v2941_v17 = vadd.f32 %v3719_v16, %v3281_v15  ;;  %v2886_v18 = vpop.f32.mrb[1].mxu1 }
 0x2d2   : > { %v2940_v19 = vadd.f32 %v3281_v15, %v2886_v18 }
 0x2d3   : > { %v2949_v20 = vmax.f32 %v2941_v17, 0.0 }
 0x2d4   : > { %v2948_v21 = vmax.f32 %v2940_v19, 0.0  ;;  %v3722_v22 = vpop.f32.mrb[2].mxu1 }
 0x2d5   : > { %2958 = vst.msk [vmem:[%s217_s6 + $0x8] sm:$0xff] %vm2956_vm4, %v2949_v20  ;;  %v2943_v23 = vadd.f32 %v3722_v22, %v3281_v15  ;;  %v2896_v24 = vpop.f32.mrb[3].mxu1 }
 0x2d6   : > { %2957 = vst.msk [vmem:[%s217_s6] sm:$0xff] %vm2956_vm4, %v2948_v21  ;;  %v2942_v25 = vadd.f32 %v3281_v15, %v2896_v24 }
 0x2d7   : > { %v2951_v26 = vmax.f32 %v2943_v23, 0.0 }
 0x2d8   : > { %v2950_v27 = vmax.f32 %v2942_v25, 0.0  ;;  %v3725_v28 = vpop.f32.mrb[4].mxu1 }
 0x2d9   : > { %2960 = vst.msk [vmem:[%s217_s6 + $0x18] sm:$0xff] %vm2956_vm4, %v2951_v26  ;;  %v2945_v29 = vadd.f32 %v3725_v28, %v3281_v15  ;;  %v2906_v30 = vpop.f32.mrb[5].mxu1 }
 0x2da   : > { %2959 = vst.msk [vmem:[%s217_s6 + $0x10] sm:$0xff] %vm2956_vm4, %v2950_v27  ;;  %v2944_v31 = vadd.f32 %v3281_v15, %v2906_v30 }
 0x2db   : > { %v2953_v32 = vmax.f32 %v2945_v29, 0.0 }
 0x2dc   : > { %v2952_v33 = vmax.f32 %v2944_v31, 0.0  ;;  %v3728_v34 = vpop.f32.mrb[6].mxu1 }
 0x2dd   : > { %2962 = vst.msk [vmem:[%s217_s6 + $0x28] sm:$0xff] %vm2956_vm4, %v2953_v32  ;;  %v2947_v35 = vadd.f32 %v3728_v34, %v3281_v15  ;;  %v2916_v36 = vpop.f32.mrb[7].mxu1 }
 0x2de   : > { %2961 = vst.msk [vmem:[%s217_s6 + $0x20] sm:$0xff] %vm2956_vm4, %v2952_v33  ;;  %v2946_v37 = vadd.f32 %v3281_v15, %v2916_v36 }
 0x2df   : > { %v2955_v38 = vmax.f32 %v2947_v35, 0.0 }
 0x2e0   : > { %v2954_v39 = vmax.f32 %v2946_v37, 0.0 }
 0x2e1   : > { %2964 = vst.msk [vmem:[%s217_s6 + $0x38] sm:$0xff] %vm2956_vm4, %v2955_v38 }
 0x2e2   : > { %2963 = vst.msk [vmem:[%s217_s6 + $0x30] sm:$0xff] %vm2956_vm4, %v2954_v39 }
 0x2e3   : > { %3949 = shalt.err (!%p3946_p3)
}
 0x2e4   : > { %s3950_s16 = scalar_lea.hbm %s4608_s11, 1024  ;;  %s3954_s25 = scalar_lea.hbm %s4662_s5, 2048 }
 0x2e5   : > { %p3951_p4 = scmp.ne.s32.totalorder %s4608_s11, %s3950_s16  ;;  %p3955_p9 = scmp.lt.u32.totalorder %s4608_s11, %s4662_s5 }
 0x2e6   : > { %p3956_p10 = scmp.lt.u32.totalorder %s3954_s25, %s3950_s16  ;;  %p3958_p12 = scmp.lt.u32.totalorder %s3950_s16, %s4608_s11 }
 0x2e7   : > { %p3952_p7 = pnand %p3951_p4, %p4072_p5 }
 0x2e8   : > { %p3957_p11 = por %p3956_p10, %p3955_p9 }
 0x2e9   : > { %p3953_p8 = pneg %p3952_p7 }
 0x2ea   : > { %p3959_p13 = por %p3958_p12, %p3957_p11 }
 0x2ec   : > { %p3960_p0 = pnand %p3959_p13, %p3953_p8 }
 0x2ee   : > { %3963 = shalt.err (!%p3960_p0)
}
 0x2ef   : > { %s4002_s6 = smov 128   ;;  %s4003_s7 = smov 8  }
 0x2f0   : > { %3894 = dma.vmem_to_hbm [thread:$0]  (%p4072_p5), %s4610_s8, 1024, %s4608_s11, %s4616_s22, %s4002_s6, %s4002_s6, %s4003_s7  }
 0x2f1 PF: > { %p3900_p1 = scmp.ge.s32.totalorder %s3998_s21, 2  ;;  %s2994_s9 = sand.u32 1, %s3986_s18  }
 0x2f2   : > { %s2995_s10 = scalar_lea.sflag [#allocation4], %s2994_s9 }
 0x2f3   : > { %p3897_p2 = pnand %p3900_p1, %p4076_p6 }
 0x2f5   : > { %3981 = dma.done.wait (!%p3897_p2), %s2995_s10, 1024  }
 0x2f6   : > { %3983 = vsyncadd (!%p3897_p2), %s2995_s10, 4294966272  ;;  %p15_p3 = scmp.ge.s32.totalorder %s4059_s24, 4   ;;  %s4665_s18 = smov %s3990_s19 }
 0x2f7   : > { %s4666_s19 = smov %s3994_s20  ;;  %s4667_s20 = smov %s4070_s27 }
 0x2f8   : > { %s4668_s21 = smov %s4059_s24  ;;  %17 = sbr.rel (!%p15_p3) target bundleno = 3 (0x3), region = 98 }
 0x2ff   :  { %3000 = vsyncpa [#allocation4], 1 }
 0x300   :  { %3002 = vsyncpa [#allocation4 + $0x1], 1 }

</bundles_post_ra>
